<compile_context>
chip_gen: v7x
topology: tpu7x:2x2x1
jax: 0.10.0
libtpu: 0.0.40
codegen_flags: <defaults>
</compile_context>

<pallas_src>
import functools

import jax
import jax.numpy as jnp
from jax.experimental import pallas as pl
from jax.experimental.pallas import tpu as pltpu

EPS = 1e-5
VMEM_LIMIT = 32 * 1024 * 1024


def _round_up(x, m):
    return (x + m - 1) // m * m


# ----------------------------------------------------------------------------
# pltpu.roll direction probe (run once, eagerly): we need rolled[i] = x[i + d].
# ----------------------------------------------------------------------------
def _roll_probe_kernel(x_ref, o_ref):
    o_ref[...] = pltpu.roll(x_ref[...], shift=1, axis=0)


@functools.lru_cache(maxsize=1)
def _roll_matches_jnp():
    x = jnp.arange(8 * 128, dtype=jnp.float32).reshape(8, 128)
    y = pl.pallas_call(
        _roll_probe_kernel,
        out_shape=jax.ShapeDtypeStruct((8, 128), jnp.float32),
    )(x)
    ref = jnp.roll(x, 1, axis=0)
    return bool(jax.device_get(jnp.all(y == ref)))


# ----------------------------------------------------------------------------
# Padded-flat activation layout ("format F") per stage.
#   buffer[n, G + h*Wp8 + w, c] = act[n, h, w, c]   (h < H, w < W)
#   all other rows (front/back guards of G rows, column margins w >= W) are 0.
# ----------------------------------------------------------------------------
class _StageCfg:
    def __init__(self, H, W):
        self.H, self.W = H, W
        self.Wp8 = _round_up(W + 2, 8)       # >= W + 2, multiple of 8
        self.G = self.Wp8 + 8                # guard rows (front and back)
        self.L = H * self.Wp8 + 2 * self.G   # multiple of 8


_STAGES = {1: _StageCfg(56, 48), 2: _StageCfg(28, 24),
           3: _StageCfg(14, 12), 4: _StageCfg(7, 6)}


def _to_padded_flat(x_nhwc, cfg):
    N, H, W, C = x_nhwc.shape
    x = jnp.pad(x_nhwc, ((0, 0), (0, 0), (0, cfg.Wp8 - W), (0, 0)))
    x = x.reshape(N, H * cfg.Wp8, C)
    return jnp.pad(x, ((0, 0), (cfg.G, cfg.G), (0, 0)))


def _from_padded_flat(xf, cfg):
    N, _, C = xf.shape
    x = xf[:, cfg.G:cfg.G + cfg.H * cfg.Wp8, :].reshape(N, cfg.H, cfg.Wp8, C)
    return x[:, :, :cfg.W, :]


def _valid_mask(cfg):
    col = (jnp.arange(cfg.Wp8) < cfg.W).astype(jnp.float32)
    core = jnp.tile(col, cfg.H)
    guard = jnp.zeros((cfg.G,), jnp.float32)
    return jnp.concatenate([guard, core, guard]).reshape(cfg.L, 1)


# ----------------------------------------------------------------------------
# Fused stride-1 3x3 conv + BN + PReLU (+ residual add) kernel.
#   acc[i, :] = sum_t  x[i + delta_t, :] @ W_t     (delta_t = (kh-1)*Wp8+(kw-1))
# implemented as 9 full-block sublane rolls + bf16 MXU dots; guard rows absorb
# the circular wrap, the validity mask zeroes every non-data row.
# ----------------------------------------------------------------------------
def _conv3x3_fused_kernel(*refs, roll_shifts, has_skip):
    if has_skip:
        (x_ref, w_ref, scale_ref, shift_ref, alpha_ref, mask_ref,
         skip_ref, o_ref, acc_ref) = refs
    else:
        (x_ref, w_ref, scale_ref, shift_ref, alpha_ref, mask_ref,
         o_ref, acc_ref) = refs
        skip_ref = None

    # f32 copy so sublane rolls never touch packed bf16 layouts.
    x32 = x_ref[0].astype(jnp.float32)                     # (L, Cin)
    for t, s in enumerate(roll_shifts):
        xs = x32 if s == 0 else pltpu.roll(x32, shift=s, axis=0)
        part = jnp.dot(xs.astype(jnp.bfloat16), w_ref[t],
                       preferred_element_type=jnp.float32)  # (L, Cout) f32
        if t == 0:
            acc_ref[...] = part
        else:
            acc_ref[...] += part

    y = acc_ref[...] * scale_ref[...] + shift_ref[...]      # folded BN (+bias)
    y = jnp.where(y > 0, y, alpha_ref[...] * y)             # per-channel PReLU
    y = y * mask_ref[...]                                   # keep zero ring
    if skip_ref is not None:
        y = y + skip_ref[0].astype(jnp.float32)             # fused residual add
    o_ref[0] = y.astype(o_ref.dtype)


def conv3x3_bn_prelu_fused(xf, p, cfg, mask, skip=None):
    N, L, Cin = xf.shape
    Cout = p["w9"].shape[-1]

    deltas = [(kh - 1) * cfg.Wp8 + (kw - 1)
              for kh in range(3) for kw in range(3)]
    if _roll_matches_jnp():          # rolled[i] = x[i + d]  <=>  jnp.roll(x, -d)
        roll_shifts = tuple((-d) % L for d in deltas)
    else:
        roll_shifts = tuple(d % L for d in deltas)

    kernel = functools.partial(_conv3x3_fused_kernel,
                               roll_shifts=roll_shifts,
                               has_skip=skip is not None)

    in_specs = [
        pl.BlockSpec((1, L, Cin), lambda n: (n, 0, 0)),
        pl.BlockSpec((9, Cin, Cout), lambda n: (0, 0, 0)),
        pl.BlockSpec((1, Cout), lambda n: (0, 0)),
        pl.BlockSpec((1, Cout), lambda n: (0, 0)),
        pl.BlockSpec((1, Cout), lambda n: (0, 0)),
        pl.BlockSpec((L, 1), lambda n: (0, 0)),
    ]
    args = [xf, p["w9"], p["scale"], p["shift"], p["alpha"], mask]
    if skip is not None:
        in_specs.append(pl.BlockSpec((1, L, Cout), lambda n: (n, 0, 0)))
        args.append(skip)

    return pl.pallas_call(
        kernel,
        out_shape=jax.ShapeDtypeStruct((N, L, Cout), jnp.bfloat16),
        grid_spec=pltpu.PrefetchScalarGridSpec(
            num_scalar_prefetch=0,
            grid=(N,),
            in_specs=in_specs,
            out_specs=pl.BlockSpec((1, L, Cout), lambda n: (n, 0, 0)),
            scratch_shapes=[pltpu.VMEM((L, Cout), jnp.float32)],
        ),
        compiler_params=pltpu.CompilerParams(
            dimension_semantics=("parallel",),
            vmem_limit_bytes=VMEM_LIMIT,
        ),
    )(*args)


# ----------------------------------------------------------------------------
# Stride-2 3x3 convs: small XLA im2col (bf16) + fused GEMM/BN/PReLU kernel.
# ----------------------------------------------------------------------------
def _gemm_bn_prelu_kernel(x_ref, w_ref, scale_ref, shift_ref, alpha_ref, o_ref):
    acc = jnp.dot(x_ref[...], w_ref[...], preferred_element_type=jnp.float32)
    y = acc * scale_ref[...] + shift_ref[...]
    o_ref[...] = jnp.where(y > 0, y, alpha_ref[...] * y).astype(o_ref.dtype)


def _pick_m_tile(M, cap=896):
    cands = [d for d in range(8, M, 8) if M % d == 0 and d <= cap]
    return max(cands) if cands else M


def _im2col_3x3_s2(x_nhwc):
    N, H, W, C = x_nhwc.shape
    xp = jnp.pad(x_nhwc, ((0, 0), (1, 1), (1, 1), (0, 0)))
    Ho = (H - 1) // 2 + 1
    Wo = (W - 1) // 2 + 1
    cols = []
    for kh in range(3):
        for kw in range(3):
            cols.append(xp[:, kh:kh + 2 * (Ho - 1) + 1:2,
                           kw:kw + 2 * (Wo - 1) + 1:2, :])
    patches = jnp.concatenate(cols, axis=-1)          # (N, Ho, Wo, 9C)
    return patches.reshape(N * Ho * Wo, 9 * C), (N, Ho, Wo)


def conv3x3_s2_bn_prelu(x_nhwc, p):
    patches, (N, Ho, Wo) = _im2col_3x3_s2(x_nhwc)
    M, K = patches.shape
    Cout = p["wk"].shape[-1]
    Mt = _pick_m_tile(M)
    out = pl.pallas_call(
        _gemm_bn_prelu_kernel,
        out_shape=jax.ShapeDtypeStruct((M, Cout), jnp.bfloat16),
        grid_spec=pltpu.PrefetchScalarGridSpec(
            num_scalar_prefetch=0,
            grid=(M // Mt,),
            in_specs=[
                pl.BlockSpec((Mt, K), lambda i: (i, 0)),
                pl.BlockSpec((K, Cout), lambda i: (0, 0)),
                pl.BlockSpec((1, Cout), lambda i: (0, 0)),
                pl.BlockSpec((1, Cout), lambda i: (0, 0)),
                pl.BlockSpec((1, Cout), lambda i: (0, 0)),
            ],
            out_specs=pl.BlockSpec((Mt, Cout), lambda i: (i, 0)),
        ),
        compiler_params=pltpu.CompilerParams(
            dimension_semantics=("parallel",),
            vmem_limit_bytes=VMEM_LIMIT,
        ),
    )(patches, p["wk"], p["scale"], p["shift"], p["alpha"])
    return out.reshape(N, Ho, Wo, Cout)


# ----------------------------------------------------------------------------
# fc5: plain Linear (bias folded into the k==0 init, accumulate into o_ref).
# ----------------------------------------------------------------------------
def _linear_bias_kernel(x_ref, w_ref, b_ref, o_ref):
    k = pl.program_id(1)

    @pl.when(k == 0)
    def _():
        o_ref[...] = jnp.broadcast_to(b_ref[...], o_ref.shape)

    o_ref[...] += jnp.dot(x_ref[...], w_ref[...],
                          preferred_element_type=jnp.float32)


def linear_bias(x, w, b, *, nt=256, kt=2688):
    M, K = x.shape
    _, N = w.shape
    assert K % kt == 0 and N % nt == 0
    return pl.pallas_call(
        _linear_bias_kernel,
        out_shape=jax.ShapeDtypeStruct((M, N), jnp.float32),
        grid_spec=pltpu.PrefetchScalarGridSpec(
            num_scalar_prefetch=0,
            grid=(N // nt, K // kt),
            in_specs=[
                pl.BlockSpec((M, kt), lambda j, k: (0, k)),
                pl.BlockSpec((kt, nt), lambda j, k: (k, j)),
                pl.BlockSpec((1, nt), lambda j, k: (0, j)),
            ],
            out_specs=pl.BlockSpec((M, nt), lambda j, k: (0, j)),
        ),
        compiler_params=pltpu.CompilerParams(
            dimension_semantics=("parallel", "arbitrary"),
            vmem_limit_bytes=VMEM_LIMIT,
        ),
    )(x, w, b)


# ----------------------------------------------------------------------------
# Synthetic parameters (shapes matching the PyTorch __init__); BN (eval-mode
# default stats) is folded into per-channel scale/shift at init; weights bf16.
# ----------------------------------------------------------------------------
_CONV_SPECS = [
    ("1_1", 3, 64, True, 2), ("1_2", 64, 64, False, 1), ("1_3", 64, 64, False, 1),
    ("2_1", 64, 128, True, 2), ("2_2", 128, 128, False, 1), ("2_3", 128, 128, False, 1),
    ("2_4", 128, 128, False, 1), ("2_5", 128, 128, False, 1),
    ("3_1", 128, 256, True, 2),
    ("3_2", 256, 256, False, 1), ("3_3", 256, 256, False, 1),
    ("3_4", 256, 256, False, 1), ("3_5", 256, 256, False, 1),
    ("3_6", 256, 256, False, 1), ("3_7", 256, 256, False, 1),
    ("3_8", 256, 256, False, 1), ("3_9", 256, 256, False, 1),
    ("4_1", 256, 512, True, 2), ("4_2", 512, 512, False, 1), ("4_3", 512, 512, False, 1),
]


def _fold_bn(cout, bias):
    gamma = jnp.ones((cout,), jnp.float32)
    beta = jnp.zeros((cout,), jnp.float32)
    mean = jnp.zeros((cout,), jnp.float32)
    var = jnp.ones((cout,), jnp.float32)
    scale = gamma / jnp.sqrt(var + EPS)
    shift = beta + scale * (bias - mean)
    return scale.reshape(1, cout), shift.reshape(1, cout)


def _conv_params(key, cin, cout, with_bias, stride):
    if with_bias:  # xavier_uniform + zero bias (PyTorch init for bias-ful convs)
        lim = float(jnp.sqrt(6.0 / (9 * cin + 9 * cout)))
        w = jax.random.uniform(key, (3, 3, cin, cout), jnp.float32, -lim, lim)
    else:          # normal(0, 0.01) for bias-less convs
        w = 0.01 * jax.random.normal(key, (3, 3, cin, cout), jnp.float32)
    bias = jnp.zeros((cout,), jnp.float32)
    scale, shift = _fold_bn(cout, bias)
    p = {"scale": scale, "shift": shift,
         "alpha": jnp.full((1, cout), 0.25, jnp.float32)}
    if stride == 2:
        p["wk"] = w.reshape(9 * cin, cout).astype(jnp.bfloat16)
    else:
        p["w9"] = w.reshape(9, cin, cout).astype(jnp.bfloat16)
    return p


def _fc_params(key, c, h, w_sp, cout):
    fan_in = c * h * w_sp
    lim = float(jnp.sqrt(6.0 / (fan_in + cout)))
    w_pt = jax.random.uniform(key, (fan_in, cout), jnp.float32, -lim, lim)
    # Pre-permute rows from PyTorch NCHW-flatten order to NHWC-flatten order so
    # the runtime flatten before fc5 is a plain reshape.
    w_nhwc = w_pt.reshape(c, h, w_sp, cout).transpose(1, 2, 0, 3).reshape(fan_in, cout)
    return {"w": w_nhwc.astype(jnp.bfloat16),
            "b": jnp.zeros((1, cout), jnp.float32)}


def init_params(seed=0):
    key = jax.random.PRNGKey(seed)
    keys = jax.random.split(key, len(_CONV_SPECS) + 1)
    P = {}
    for k, (name, cin, cout, wb, stride) in zip(keys[:-1], _CONV_SPECS):
        P[name] = _conv_params(k, cin, cout, wb, stride)
    P["fc5"] = _fc_params(keys[-1], 512, 7, 6, 512)
    return P


# ----------------------------------------------------------------------------
# Full forward pass (mirrors sphere20_bd.forward, eval mode).
# ----------------------------------------------------------------------------
@jax.jit
def sphere20_bd_forward(x_nchw, P):
    x = jnp.transpose(x_nchw, (0, 2, 3, 1)).astype(jnp.bfloat16)   # NCHW -> NHWC

    def res_block(xf, pa, pb, cfg, mask):
        t = conv3x3_bn_prelu_fused(xf, pa, cfg, mask)
        return conv3x3_bn_prelu_fused(t, pb, cfg, mask, skip=xf)

    # ---- stage 1 ----
    cfg = _STAGES[1]
    mask = _valid_mask(cfg)
    x = conv3x3_s2_bn_prelu(x, P["1_1"])
    xf = _to_padded_flat(x, cfg)
    xf = res_block(xf, P["1_2"], P["1_3"], cfg, mask)

    # ---- stage 2 ----
    x = _from_padded_flat(xf, cfg)
    cfg = _STAGES[2]
    mask = _valid_mask(cfg)
    x = conv3x3_s2_bn_prelu(x, P["2_1"])
    xf = _to_padded_flat(x, cfg)
    xf = res_block(xf, P["2_2"], P["2_3"], cfg, mask)
    xf = res_block(xf, P["2_4"], P["2_5"], cfg, mask)

    # ---- stage 3 ----
    x = _from_padded_flat(xf, cfg)
    cfg = _STAGES[3]
    mask = _valid_mask(cfg)
    x = conv3x3_s2_bn_prelu(x, P["3_1"])
    xf = _to_padded_flat(x, cfg)
    for a, b in (("3_2", "3_3"), ("3_4", "3_5"), ("3_6", "3_7"), ("3_8", "3_9")):
        xf = res_block(xf, P[a], P[b], cfg, mask)

    # ---- stage 4 ----
    x = _from_padded_flat(xf, cfg)
    cfg = _STAGES[4]
    mask = _valid_mask(cfg)
    x = conv3x3_s2_bn_prelu(x, P["4_1"])
    xf = _to_padded_flat(x, cfg)
    xf = res_block(xf, P["4_2"], P["4_3"], cfg, mask)

    # ---- head ----
    x = _from_padded_flat(xf, cfg)                 # (N, 7, 6, 512) bf16
    n = x.shape[0]
    x = x.reshape(n, -1)                           # NHWC flatten (fc5 weight pre-permuted)
    # Dropout: identity in eval mode.
    return linear_bias(x, P["fc5"]["w"], P["fc5"]["b"])


if __name__ == "__main__":
    # Calibrate pltpu.roll's direction once, eagerly (before tracing).
    _roll_matches_jnp()

    # Smallest input consistent with the module (fc5 fixes spatial to 112x96):
    # batch=2, NCHW float32.
    key = jax.random.PRNGKey(0)
    x = jax.random.normal(key, (2, 3, 112, 96), jnp.float32)
    params = init_params(seed=0)

    out = sphere20_bd_forward(x, params)
    out = jax.block_until_ready(out)

    assert out.shape == (2, 512), out.shape
    assert bool(jnp.all(jnp.isfinite(out)))
    print("KERNEL_OK")
</pallas_src>

<mosaic_0001>
module attributes {stable_mosaic.version = 11 : i64} {
  func.func @_roll_probe_kernel(%arg0: memref<8x128xf32, #tpu.memory_space<vmem>>, %arg1: memref<8x128xf32, #tpu.memory_space<vmem>>) attributes {dimension_semantics = [], scalar_prefetch = 0 : i64, scratch_operands = 0 : i64, tpu.core_type = #tpu.core_type<tc>} {
    %c0 = arith.constant 0 : index
    %c0_0 = arith.constant 0 : index
    %0 = vector.load %arg0[%c0, %c0_0] : memref<8x128xf32, #tpu.memory_space<vmem>>, vector<8x128xf32>
    %c1_i32 = arith.constant 1 : i32
    %1 = tpu.dynamic_rotate %0 by %c1_i32 dim 0 : vector<8x128xf32>, i32 -> vector<8x128xf32>
    %c0_1 = arith.constant 0 : index
    %c0_2 = arith.constant 0 : index
    %2 = vector.load %arg1[%c0_1, %c0_2] : memref<8x128xf32, #tpu.memory_space<vmem>>, vector<8x128xf32>
    tpu.vector_store %arg1[%c0_1, %c0_2], %1 {strides = array<i32>} : memref<8x128xf32, #tpu.memory_space<vmem>>, vector<8x128xf32>,
    return
  }
}

</mosaic_0001>

<bundles_post_ra>
// kernel: tpu_custom_call.1
= control target key start
LH: loop header
LB: loop body
LE: loop exit
PB: predicated region body
PF: predicated region fallthrough
CT: control target
= control target key end

     0   :  { %6 = vsyncpa [#allocation3], 0  ;;  %s125_s0 = inlined_call_operand.hbm [shape: f32[8,128], index: 0, kind: input, shape index: {}]   ;;  %s126_s1 = inlined_call_operand.hbm [shape: f32[8,128], index: 1, kind: output, shape index: {}]  }
   0x1   :  { %7 = vsyncpa [#allocation4], 0  ;;  %s89_s6 = smov [#allocation2]   ;;  %s41_s10 = scalar_lea.hbm %s125_s0, 128 }
   0x2   :  { %s14_s7 = sshll.u32 %s89_s6, 4  ;;  %p42_p0 = scmp.ne.s32.totalorder %s125_s0, %s41_s10  ;;  %s15_s7 = int_to_ptr.vmem [resolvable:$true] %s14_s7 }
   0x3   :  { %p45_p1 = scmp.lt.u32.totalorder %s41_s10, %s125_s0 }
   0x5   :  { %p47_p2 = pnand %p45_p1, %p42_p0 }
   0x7   :  { %50 = shalt.err (!%p47_p2)
}
   0x8   :  { %s51_s15 = scalar_lea.vmem %s15_s7, 128  ;;  %p56_p4 = scmp.lt.s32.totalorder %s15_s7, %s15_s7 }
   0x9   :  { %p52_p3 = scmp.ne.s32.totalorder %s15_s7, %s51_s15  ;;  %p57_p5 = scmp.lt.s32.totalorder %s51_s15, %s51_s15 }
   0xb   :  { %p58_p6 = por %p57_p5, %p56_p4 }
   0xd   :  { %p59_p7 = pnand %p58_p6, %p52_p3 }
   0xf   :  { %62 = shalt.err (!%p59_p7)
}
  0x10   :  { %17 = dma.hbm_to_vmem [thread:$0]  %s125_s0, 128, %s15_s7, [#allocation3]  }
  0x11   :  { %85 = dma.done.wait [#allocation3], 128  }
  0x12   :  { %86 = vsyncadd [#allocation3], 4294967168  ;;  %s90_s18 = smov [#allocation5]   ;;  %v21_v0 = vld [vmem:[#allocation2] sm:$0xff] }
  0x13   :  { %s30_s19 = sshll.u32 %s90_s18, 4  ;;  %v22_v1 = vrot.slane %v21_v0, 7  ;;  %s31_s19 = int_to_ptr.vmem [resolvable:$true] %s30_s19 }
  0x14   :  { %s63_s20 = scalar_lea.vmem %s31_s19, 128  ;;  %p68_p9 = scmp.lt.s32.totalorder %s31_s19, %s31_s19 }
  0x15   :  { %23 = vst [vmem:[#allocation5] sm:$0xff] %v22_v1  ;;  %p64_p8 = scmp.ne.s32.totalorder %s31_s19, %s63_s20  ;;  %p69_p10 = scmp.lt.s32.totalorder %s63_s20, %s63_s20 }
  0x17   :  { %p70_p11 = por %p69_p10, %p68_p9 }
  0x19   :  { %p71_p12 = pnand %p70_p11, %p64_p8 }
  0x1b   :  { %74 = shalt.err (!%p71_p12)
}
  0x1c   :  { %s75_s23 = scalar_lea.hbm %s126_s1, 128 }
  0x1d   :  { %p76_p13 = scmp.ne.s32.totalorder %s126_s1, %s75_s23  ;;  %p79_p0 = scmp.lt.u32.totalorder %s75_s23, %s126_s1 }
  0x1f   :  { %p81_p1 = pnand %p79_p0, %p76_p13 }
  0x21   :  { %84 = shalt.err (!%p81_p1)
}
  0x22   :  { %33 = dma.vmem_to_hbm [thread:$0]  %s31_s19, 128, %s126_s1, [#allocation4]  }
  0x23   :  { %87 = dma.done.wait [#allocation4], 128  }
  0x24   :  { %88 = vsyncadd [#allocation4], 4294967168 }
  0x25   :  { %37 = vsyncpa [#allocation3], 1 }
  0x26   :  { %38 = vsyncpa [#allocation4], 1 }

</bundles_post_ra>
